<compile_context>
chip_gen: v5e
topology: v5e:2x2
jax: 0.10.0
libtpu: 0.0.40
codegen_flags: <defaults>
</compile_context>

<pallas_src>
import functools

import jax
import jax.numpy as jnp
from jax.experimental import pallas as pl
from jax.experimental.pallas import tpu as pltpu

LANE = 128


def _round_up(n, m):
    return ((n + m - 1) // m) * m


def _pad_axis(a, axis, target):
    pad = target - a.shape[axis]
    if pad == 0:
        return a
    widths = [(0, 0)] * a.ndim
    widths[axis] = (0, pad)
    return jnp.pad(a, widths)


def mlp_kernel(x_ref, w1_ref, b1_ref, w2_ref, b2_ref, w3_ref, b3_ref, o_ref):
    """sigmoid(relu(relu(x@W1+b1)@W2+b2)@W3+b3) for one batch tile, all f32."""
    # fc1 -> relu
    h1 = jnp.dot(x_ref[...], w1_ref[...], preferred_element_type=jnp.float32)
    h1 = jnp.maximum(h1 + b1_ref[...], 0.0)
    # fc2 -> relu
    h2 = jnp.dot(h1, w2_ref[...], preferred_element_type=jnp.float32)
    h2 = jnp.maximum(h2 + b2_ref[...], 0.0)
    # out -> sigmoid (stored at the real output width)
    z = jnp.dot(h2, w3_ref[...], preferred_element_type=jnp.float32) + b3_ref[...]
    o_ref[...] = jax.nn.sigmoid(z)


def _choose_batch_tile(B, max_tile):
    """Pick (tile_rows, padded_batch).
    - tiny batch: one block equal to the whole batch (no padding at all)
    - moderate batch: 2 tiles so v7x megacore can use both TensorCores
    - large batch: enough tiles that tile <= max_tile, 8-row aligned, minimal tail."""
    if B < 256:
        return B, B
    b8 = _round_up(B, 8)
    n_tiles = max(2, -(-b8 // max_tile))
    tb = _round_up(-(-b8 // n_tiles), 8)
    return tb, _round_up(b8, tb)


def prepare_params(w1, b1, w2, b2, w3, b3):
    """One-time padding of the HIDDEN dims to 128-lane multiples (hoisted out of the
    per-call path). n_input and n_output stay unpadded: x comes in raw and the output
    is written at its real width. Zero-padded weight cols + zero biases keep the math
    exact (ReLU(0)=0 propagates zeros)."""
    h1_p = _round_up(w1.shape[1], LANE)
    h2_p = _round_up(w2.shape[1], LANE)
    w1_p = _pad_axis(w1, 1, h1_p).astype(jnp.float32)            # (n_in, h1_p)
    b1_p = _pad_axis(b1, 1, h1_p).astype(jnp.float32)            # (1, h1_p)
    w2_p = _pad_axis(_pad_axis(w2, 0, h1_p), 1, h2_p).astype(jnp.float32)  # (h1_p, h2_p)
    b2_p = _pad_axis(b2, 1, h2_p).astype(jnp.float32)            # (1, h2_p)
    w3_p = _pad_axis(w3, 0, h2_p).astype(jnp.float32)            # (h2_p, n_out)
    b3_p = b3.astype(jnp.float32)                                # (1, n_out)
    return w1_p, b1_p, w2_p, b2_p, w3_p, b3_p


@functools.partial(jax.jit, static_argnames=("max_tile",))
def net_forward(x, w1_p, b1_p, w2_p, b2_p, w3_p, b3_p, *, max_tile=2048):
    """y = sigmoid(relu(relu(x@W1+b1)@W2+b2)@W3+b3) matching Net.forward in f32.
    Takes pre-padded params from prepare_params(); x is unpadded (B, n_input)."""
    B, n_in = x.shape
    h1_p = w1_p.shape[1]
    h2_p = w2_p.shape[1]
    n_out = w3_p.shape[1]

    tb, b_p = _choose_batch_tile(B, max_tile)
    grid = (b_p // tb,)

    x_f = x.astype(jnp.float32)
    if b_p != B:
        x_f = _pad_axis(x_f, 0, b_p)  # row-only padding for even tiles (rare, cheap)

    const = lambda i: (0, 0)  # weights/biases: same block every step -> VMEM-resident

    # Real batch, real in/out widths; hidden dims are padded (that IS the MXU work).
    cost = pl.CostEstimate(
        flops=2 * B * (n_in * h1_p + h1_p * h2_p + h2_p * n_out),
        transcendentals=B * n_out,
        bytes_accessed=4 * (B * n_in
                            + w1_p.size + b1_p.size + w2_p.size + b2_p.size
                            + w3_p.size + b3_p.size
                            + B * n_out),
    )

    out = pl.pallas_call(
        mlp_kernel,
        out_shape=jax.ShapeDtypeStruct((b_p, n_out), jnp.float32),
        grid=grid,
        in_specs=[
            pl.BlockSpec((tb, n_in), lambda i: (i, 0)),   # x: tiled over batch, raw lanes
            pl.BlockSpec((n_in, h1_p), const),
            pl.BlockSpec((1, h1_p), const),
            pl.BlockSpec((h1_p, h2_p), const),
            pl.BlockSpec((1, h2_p), const),
            pl.BlockSpec((h2_p, n_out), const),
            pl.BlockSpec((1, n_out), const),
        ],
        out_specs=pl.BlockSpec((tb, n_out), lambda i: (i, 0)),   # real output width
        compiler_params=pltpu.CompilerParams(
            dimension_semantics=("parallel",)),   # shard batch grid across TCs (v7x)
        cost_estimate=cost,
    )(x_f, w1_p, b1_p, w2_p, b2_p, w3_p, b3_p)

    return out if b_p == B else out[:B]


def make_params_from_flat(weights, n_input, n_hidden1, n_hidden2, n_output):
    """Mirror Net.update_weights: slice a flat weight vector into layer params.
    PyTorch stores Linear weight as [out, in]; transpose to [in, out] for the kernel.
    Biases kept 2-D [1, out] for TPU-friendly broadcasting."""
    weights = jnp.asarray(weights, dtype=jnp.float32)
    x = n_input * n_hidden1
    xx = x + n_hidden1
    y = xx + n_hidden1 * n_hidden2
    yy = y + n_hidden2
    z = yy + n_hidden2 * n_output
    w1 = weights[:x].reshape(n_hidden1, n_input).T          # [n_input, n_hidden1]
    b1 = weights[x:xx].reshape(1, n_hidden1)
    w2 = weights[xx:y].reshape(n_hidden2, n_hidden1).T      # [n_hidden1, n_hidden2]
    b2 = weights[y:yy].reshape(1, n_hidden2)
    w3 = weights[yy:z].reshape(n_output, n_hidden2).T       # [n_hidden2, n_output]
    b3 = weights[z:].reshape(1, n_output)
    return w1, b1, w2, b2, w3, b3


def reference_forward(x, w1, b1, w2, b2, w3, b3):
    h1 = jnp.maximum(x @ w1 + b1, 0.0)
    h2 = jnp.maximum(h1 @ w2 + b2, 0.0)
    return jax.nn.sigmoid(h2 @ w3 + b3)


def net_forward_auto(x, raw_params, padded_params, *, small_batch_threshold=256):
    """At tiny batches the fused XLA dot chain beats pallas_call launch overhead;
    the Pallas kernel pays off once the batch is in the hundreds+."""
    if x.shape[0] < small_batch_threshold:
        return reference_forward(x, *raw_params)
    return net_forward(x, *padded_params)


if __name__ == "__main__":
    # Small shapes consistent with the module's forward (pure MLP on [B, n_input]).
    n_input, n_hidden1, n_hidden2, n_output = 16, 32, 32, 8

    key = jax.random.PRNGKey(0)
    k_w, k_x1, k_x2 = jax.random.split(key, 3)

    total = (n_input * n_hidden1 + n_hidden1
             + n_hidden1 * n_hidden2 + n_hidden2
             + n_hidden2 * n_output + n_output)
    flat_weights = jax.random.normal(k_w, (total,), dtype=jnp.float32) * 0.1
    raw_params = make_params_from_flat(flat_weights, n_input, n_hidden1, n_hidden2, n_output)
    padded_params = prepare_params(*raw_params)   # one-time, outside the per-call path

    # 1) Tiny batch (demo shape): single-block Pallas path, exact f32 parity.
    x_small = jax.random.normal(k_x1, (2, n_input), dtype=jnp.float32)
    out_small = jax.block_until_ready(net_forward(x_small, *padded_params))
    ref_small = reference_forward(x_small, *raw_params)
    assert out_small.shape == (2, n_output)
    err_small = float(jnp.abs(out_small - ref_small).max())
    assert jnp.allclose(out_small, ref_small, atol=1e-4, rtol=0.0), err_small

    # 2) Mid-size batch: exercises the 2-step parallel grid (v7x megacore) and
    #    the small batch-row tail padding path.
    x_big = jax.random.normal(k_x2, (600, n_input), dtype=jnp.float32)
    out_big = jax.block_until_ready(net_forward(x_big, *padded_params))
    ref_big = reference_forward(x_big, *raw_params)
    assert out_big.shape == (600, n_output)
    err_big = float(jnp.abs(out_big - ref_big).max())
    assert jnp.allclose(out_big, ref_big, atol=1e-4, rtol=0.0), err_big

    print("KERNEL_OK")
</pallas_src>

<mosaic_0001>
module attributes {stable_mosaic.version = 11 : i64} {
  func.func @mlp_kernel(%arg0: i32, %arg1: memref<2x16xf32, #tpu.memory_space<vmem>>, %arg2: memref<16x128xf32, #tpu.memory_space<vmem>>, %arg3: memref<1x128xf32, #tpu.memory_space<vmem>>, %arg4: memref<128x128xf32, #tpu.memory_space<vmem>>, %arg5: memref<1x128xf32, #tpu.memory_space<vmem>>, %arg6: memref<128x8xf32, #tpu.memory_space<vmem>>, %arg7: memref<1x8xf32, #tpu.memory_space<vmem>>, %arg8: memref<2x8xf32, #tpu.memory_space<vmem>>) attributes {dimension_semantics = [#tpu.dimension_semantics<parallel>], iteration_bounds = array<i64: 1>, scalar_prefetch = 0 : i64, scratch_operands = 0 : i64, tpu.core_type = #tpu.core_type<tc>, window_params = [{transform_indices = @transform_0, window_bounds = array<i64: 2, 16>}, {pipeline_mode = #tpu.pipeline_mode<synchronous>, transform_indices = @transform_1, window_bounds = array<i64: 16, 128>}, {pipeline_mode = #tpu.pipeline_mode<synchronous>, transform_indices = @transform_2, window_bounds = array<i64: 1, 128>}, {pipeline_mode = #tpu.pipeline_mode<synchronous>, transform_indices = @transform_3, window_bounds = array<i64: 128, 128>}, {pipeline_mode = #tpu.pipeline_mode<synchronous>, transform_indices = @transform_4, window_bounds = array<i64: 1, 128>}, {pipeline_mode = #tpu.pipeline_mode<synchronous>, transform_indices = @transform_5, window_bounds = array<i64: 128, 8>}, {pipeline_mode = #tpu.pipeline_mode<synchronous>, transform_indices = @transform_6, window_bounds = array<i64: 1, 8>}, {transform_indices = @transform_7, window_bounds = array<i64: 2, 8>}]} {
    %c0 = arith.constant 0 : index
    %c0_0 = arith.constant 0 : index
    %0 = vector.load %arg1[%c0, %c0_0] : memref<2x16xf32, #tpu.memory_space<vmem>>, vector<2x16xf32>
    %c0_1 = arith.constant 0 : index
    %c0_2 = arith.constant 0 : index
    %1 = vector.load %arg2[%c0_1, %c0_2] : memref<16x128xf32, #tpu.memory_space<vmem>>, vector<16x128xf32>
    %cst = arith.constant dense<0.000000e+00> : vector<2x128xf32>
    %2 = tpu.matmul %0, %1, %cst {dimension_numbers = #tpu.dot_dimension_numbers<[1], [0], [0], [1], [0, 0, 1, 1], [], []>} : vector<2x16xf32>, vector<16x128xf32>, vector<2x128xf32> -> vector<2x128xf32>
    %c0_3 = arith.constant 0 : index
    %c0_4 = arith.constant 0 : index
    %3 = vector.load %arg3[%c0_3, %c0_4] : memref<1x128xf32, #tpu.memory_space<vmem>>, vector<1x128xf32>
    %4 = vector.broadcast %3 : vector<1x128xf32> to vector<2x128xf32>
    %5 = arith.addf %2, %4 : vector<2x128xf32>
    %cst_5 = arith.constant 0.000000e+00 : f32
    %6 = vector.broadcast %cst_5 : f32 to vector<2x128xf32>
    %7 = arith.maximumf %5, %6 : vector<2x128xf32>
    %c0_6 = arith.constant 0 : index
    %c0_7 = arith.constant 0 : index
    %8 = vector.load %arg4[%c0_6, %c0_7] : memref<128x128xf32, #tpu.memory_space<vmem>>, vector<128x128xf32>
    %cst_8 = arith.constant dense<0.000000e+00> : vector<2x128xf32>
    %9 = tpu.matmul %7, %8, %cst_8 {dimension_numbers = #tpu.dot_dimension_numbers<[1], [0], [0], [1], [0, 0, 1, 1], [], []>} : vector<2x128xf32>, vector<128x128xf32>, vector<2x128xf32> -> vector<2x128xf32>
    %c0_9 = arith.constant 0 : index
    %c0_10 = arith.constant 0 : index
    %10 = vector.load %arg5[%c0_9, %c0_10] : memref<1x128xf32, #tpu.memory_space<vmem>>, vector<1x128xf32>
    %11 = vector.broadcast %10 : vector<1x128xf32> to vector<2x128xf32>
    %12 = arith.addf %9, %11 : vector<2x128xf32>
    %cst_11 = arith.constant 0.000000e+00 : f32
    %13 = vector.broadcast %cst_11 : f32 to vector<2x128xf32>
    %14 = arith.maximumf %12, %13 : vector<2x128xf32>
    %c0_12 = arith.constant 0 : index
    %c0_13 = arith.constant 0 : index
    %15 = vector.load %arg6[%c0_12, %c0_13] : memref<128x8xf32, #tpu.memory_space<vmem>>, vector<128x8xf32>
    %cst_14 = arith.constant dense<0.000000e+00> : vector<2x8xf32>
    %16 = tpu.matmul %14, %15, %cst_14 {dimension_numbers = #tpu.dot_dimension_numbers<[1], [0], [0], [1], [0, 0, 1, 1], [], []>} : vector<2x128xf32>, vector<128x8xf32>, vector<2x8xf32> -> vector<2x8xf32>
    %c0_15 = arith.constant 0 : index
    %c0_16 = arith.constant 0 : index
    %17 = vector.load %arg7[%c0_15, %c0_16] : memref<1x8xf32, #tpu.memory_space<vmem>>, vector<1x8xf32>
    %18 = vector.broadcast %17 : vector<1x8xf32> to vector<2x8xf32>
    %19 = arith.addf %16, %18 : vector<2x8xf32>
    %20 = arith.negf %19 : vector<2x8xf32>
    %21 = math.exp %20 : vector<2x8xf32>
    %cst_17 = arith.constant 1.000000e+00 : f32
    %22 = vector.broadcast %cst_17 : f32 to vector<2x8xf32>
    %23 = arith.addf %22, %21 : vector<2x8xf32>
    %24 = arith.divf %22, %23 : vector<2x8xf32>
    %c0_18 = arith.constant 0 : index
    %c0_19 = arith.constant 0 : index
    %25 = vector.load %arg8[%c0_18, %c0_19] : memref<2x8xf32, #tpu.memory_space<vmem>>, vector<2x8xf32>
    tpu.vector_store %arg8[%c0_18, %c0_19], %24 {strides = array<i32>} : memref<2x8xf32, #tpu.memory_space<vmem>>, vector<2x8xf32>,
    return
  }
  func.func @transform_0(%arg0: i32) -> (i32, i32) {
    %c0_i32 = arith.constant 0 : i32
    %c0_i32_0 = arith.constant 0 : i32
    return %arg0, %c0_i32 : i32, i32
  }
  func.func @transform_1(%arg0: i32) -> (i32, i32) {
    %c0_i32 = arith.constant 0 : i32
    %c0_i32_0 = arith.constant 0 : i32
    %c0_i32_1 = arith.constant 0 : i32
    return %c0_i32, %c0_i32_0 : i32, i32
  }
  func.func @transform_2(%arg0: i32) -> (i32, i32) {
    %c0_i32 = arith.constant 0 : i32
    %c0_i32_0 = arith.constant 0 : i32
    %c0_i32_1 = arith.constant 0 : i32
    return %c0_i32, %c0_i32_0 : i32, i32
  }
  func.func @transform_3(%arg0: i32) -> (i32, i32) {
    %c0_i32 = arith.constant 0 : i32
    %c0_i32_0 = arith.constant 0 : i32
    %c0_i32_1 = arith.constant 0 : i32
    return %c0_i32, %c0_i32_0 : i32, i32
  }
  func.func @transform_4(%arg0: i32) -> (i32, i32) {
    %c0_i32 = arith.constant 0 : i32
    %c0_i32_0 = arith.constant 0 : i32
    %c0_i32_1 = arith.constant 0 : i32
    return %c0_i32, %c0_i32_0 : i32, i32
  }
  func.func @transform_5(%arg0: i32) -> (i32, i32) {
    %c0_i32 = arith.constant 0 : i32
    %c0_i32_0 = arith.constant 0 : i32
    %c0_i32_1 = arith.constant 0 : i32
    return %c0_i32, %c0_i32_0 : i32, i32
  }
  func.func @transform_6(%arg0: i32) -> (i32, i32) {
    %c0_i32 = arith.constant 0 : i32
    %c0_i32_0 = arith.constant 0 : i32
    %c0_i32_1 = arith.constant 0 : i32
    return %c0_i32, %c0_i32_0 : i32, i32
  }
  func.func @transform_7(%arg0: i32) -> (i32, i32) {
    %c0_i32 = arith.constant 0 : i32
    %c0_i32_0 = arith.constant 0 : i32
    return %arg0, %c0_i32 : i32, i32
  }
}

</mosaic_0001>

<bundles_post_ra>
// kernel: net_forward.1
= control target key start
LH: loop header
LB: loop body
LE: loop exit
PB: predicated region body
PF: predicated region fallthrough
CT: control target
= control target key end

     0   :  { %12 = vsyncpa [#allocation3], 0  ;;  %s417_s0 = inlined_call_operand.vmem [shape: f32[2,16], index: 0, kind: input, shape index: {}]   ;;  %s418_s1 = inlined_call_operand.hbm [shape: f32[16,128], index: 1, kind: input, shape index: {}]   ;;  %s419_s2 = inlined_call_operand.vmem [shape: f32[1,128], index: 2, kind: input, shape index: {}]   ;;  %s420_s3 = inlined_call_operand.vmem [shape: f32[128,128], index: 3, kind: input, shape index: {}]   ;;  %s421_s4 = inlined_call_operand.vmem [shape: f32[1,128], index: 4, kind: input, shape index: {}]   ;;  %s422_s5 = inlined_call_operand.vmem [shape: f32[128,8], index: 5, kind: input, shape index: {}]   ;;  %s423_s6 = inlined_call_operand.vmem [shape: f32[1,8], index: 6, kind: input, shape index: {}]   ;;  %s424_s7 = inlined_call_operand.hbm [shape: f32[2,8], index: 7, kind: output, shape index: {}]  }
   0x1   :  { %13 = vsyncpa [#allocation4], 0  ;;  %s20_s26 = sshll.u32 %s418_s1, 4  ;;  %s259_s27 = smov [#allocation2]   ;;  %s21_s26 = int_to_ptr.hbm [resolvable:$true] %s20_s26 }
   0x2   :  { %s22_s28 = sshll.u32 %s259_s27, 4  ;;  %s260_s29 = smov 128   ;;  %s23_s28 = int_to_ptr.vmem [resolvable:$true] %s22_s28 }
   0x3   :  { %s261_s30 = smov 8  }
   0x4   :  { %28 = dma.hbm_to_vmem [thread:$0]  %s21_s26, 256, %s23_s28, [#allocation3], %s260_s29, %s260_s29, %s261_s30  }
   0x5   :  { %255 = dma.done.wait [#allocation3], 256  }
   0x6   :  { %256 = vsyncadd [#allocation3], 4294967040  ;;  %v45_v0 = vld [vmem:[#allocation2 + $0x8] sm:$0xff]  ;;  %v44_v1 = vld [vmem:[#allocation2] sm:$0xff]  ;;  %vm50_vm0 = vcmask 130048   ;;  %vm175_vm4 = vcmask 58368  }
   0x7   :  { %68 = vmatpush.msra.mxu0 %v45_v0  ;;  %v43_v2 = vld [vmem:[%s417_s0] sm:$0x3]  ;;  %v90_v3 = vld [vmem:[%s420_s3 + $0x78] sm:$0xff]  ;;  %v89_v4 = vld [vmem:[%s420_s3 + $0x70] sm:$0xff] }
   0x8   :  { %95 = vmatpush.msra.mxu1 %v90_v3  ;;  %v88_v5 = vld [vmem:[%s420_s3 + $0x68] sm:$0xff]  ;;  %v87_v6 = vld [vmem:[%s420_s3 + $0x60] sm:$0xff]  ;;  %v86_v7 = vld [vmem:[%s420_s3 + $0x58] sm:$0xff] }
   0x9   :  { %69 = vmatpush.msra.mxu0 %v44_v1  ;;  %v85_v8 = vld [vmem:[%s420_s3 + $0x50] sm:$0xff]  ;;  %v84_v9 = vld [vmem:[%s420_s3 + $0x48] sm:$0xff]  ;;  %v83_v10 = vld [vmem:[%s420_s3 + $0x40] sm:$0xff] }
   0xa   :  { %194 = vmatmul.msk.f32.vlgmr.msra.gmra.mxu0 %vm50_vm0, %v43_v2  ;;  %96 = vmatpush.msra.mxu1 %v89_v4  ;;  %v82_v11 = vld [vmem:[%s420_s3 + $0x38] sm:$0xff]  ;;  %v81_v12 = vld [vmem:[%s420_s3 + $0x30] sm:$0xff]  ;;  %v80_v13 = vld [vmem:[%s420_s3 + $0x28] sm:$0xff] }
   0xb   :  { %v79_v14 = vld [vmem:[%s420_s3 + $0x20] sm:$0xff]  ;;  %v78_v15 = vld [vmem:[%s420_s3 + $0x18] sm:$0xff]  ;;  %v77_v16 = vld [vmem:[%s420_s3 + $0x10] sm:$0xff] }
   0xc   :  { %97 = vmatpush.msra.mxu1 %v88_v5  ;;  %v76_v17 = vld [vmem:[%s420_s3 + $0x8] sm:$0xff]  ;;  %v75_v18 = vld [vmem:[%s420_s3] sm:$0xff]  ;;  %v131_v19 = vld [vmem:[%s422_s5 + $0x78] sm:$0xff] }
   0xd   :  { %v130_v20 = vld [vmem:[%s422_s5 + $0x70] sm:$0xff]  ;;  %136 = vmatpush.msra.mxu2 %v131_v19  ;;  %v129_v21 = vld [vmem:[%s422_s5 + $0x68] sm:$0xff]  ;;  %v128_v22 = vld [vmem:[%s422_s5 + $0x60] sm:$0xff] }
   0xe   :  { %98 = vmatpush.msra.mxu1 %v87_v6  ;;  %v127_v23 = vld [vmem:[%s422_s5 + $0x58] sm:$0xff]  ;;  %v126_v24 = vld [vmem:[%s422_s5 + $0x50] sm:$0xff]  ;;  %v125_v25 = vld [vmem:[%s422_s5 + $0x48] sm:$0xff] }
   0xf   :  { %137 = vmatpush.msra.mxu2 %v130_v20  ;;  %v124_v26 = vld [vmem:[%s422_s5 + $0x40] sm:$0xff]  ;;  %v123_v27 = vld [vmem:[%s422_s5 + $0x38] sm:$0xff]  ;;  %v122_v28 = vld [vmem:[%s422_s5 + $0x30] sm:$0xff] }
  0x10   :  { %99 = vmatpush.msra.mxu1 %v86_v7  ;;  %v121_v29 = vld [vmem:[%s422_s5 + $0x28] sm:$0xff]  ;;  %v120_v30 = vld [vmem:[%s422_s5 + $0x20] sm:$0xff]  ;;  %v119_v31 = vld [vmem:[%s422_s5 + $0x18] sm:$0xff] }
  0x11   :  { %138 = vmatpush.msra.mxu2 %v129_v21  ;;  %v200_v32 = vld [vmem:[%s419_s2] ss:$0 sm:$0xff]  ;;  %v118_v36 = vld [vmem:[%s422_s5 + $0x10] sm:$0xff]  ;;  %v117_v37 = vld [vmem:[%s422_s5 + $0x8] sm:$0xff] }
  0x12   :  { %100 = vmatpush.msra.mxu1 %v85_v8  ;;  %v116_v38 = vld [vmem:[%s422_s5] sm:$0xff] }
  0x13   :  { %139 = vmatpush.msra.mxu2 %v128_v22  ;;  %v201_v39 = vld [vmem:[%s421_s4] ss:$0 sm:$0xff]  ;;  %s262_s4 = smov [#allocation5]  }
  0x14   :  { %101 = vmatpush.msra.mxu1 %v84_v9  ;;  %v202_v43 = vld [vmem:[%s423_s6] ss:$0 sm:$0xff]  ;;  %s182_s5 = sshll.u32 %s262_s4, 4  ;;  %s184_s6 = sshll.u32 %s424_s7, 4  ;;  %s183_s5 = int_to_ptr.vmem [resolvable:$true] %s182_s5  ;;  %s185_s6 = int_to_ptr.hbm [resolvable:$true] %s184_s6 }
  0x15   :  { %140 = vmatpush.msra.mxu2 %v127_v23 }
  0x16   :  { %102 = vmatpush.msra.mxu1 %v83_v10 }
  0x17   :  { %141 = vmatpush.msra.mxu2 %v126_v24 }
  0x18   :  { %103 = vmatpush.msra.mxu1 %v82_v11 }
  0x19   :  { %142 = vmatpush.msra.mxu2 %v125_v25 }
  0x1a   :  { %104 = vmatpush.msra.mxu1 %v81_v12 }
  0x1b   :  { %143 = vmatpush.msra.mxu2 %v124_v26 }
  0x1c   :  { %105 = vmatpush.msra.mxu1 %v80_v13 }
  0x1d   :  { %144 = vmatpush.msra.mxu2 %v123_v27 }
  0x1e   :  { %106 = vmatpush.msra.mxu1 %v79_v14 }
  0x1f   :  { %145 = vmatpush.msra.mxu2 %v122_v28 }
  0x20   :  { %107 = vmatpush.msra.mxu1 %v78_v15 }
  0x21   :  { %146 = vmatpush.msra.mxu2 %v121_v29 }
  0x22   :  { %108 = vmatpush.msra.mxu1 %v77_v16 }
  0x23   :  { %147 = vmatpush.msra.mxu2 %v120_v30 }
  0x24   :  { %109 = vmatpush.msra.mxu1 %v76_v17 }
  0x25   :  { %148 = vmatpush.msra.mxu2 %v119_v31 }
  0x26   :  { %110 = vmatpush.msra.mxu1 %v75_v18 }
  0x27   :  { %149 = vmatpush.msra.mxu2 %v118_v36 }
  0x29   :  { %150 = vmatpush.msra.mxu2 %v117_v37 }
  0x2b   :  { %151 = vmatpush.msra.mxu2 %v116_v38 }
  0x87   :  { %v71_v33 = vpop.f32.mrf.mxu0 }
  0x88   :  { %v72_v34 = vadd.f32 %v200_v32, %v71_v33 }
  0x8a   :  { %v74_v35 = vmax.f32 %v72_v34, 0.0 }
  0x8c   :  { %111 = vmatmul.f32.vlgmr.msra.gmra.mxu1 %v74_v35 }
 0x109   :  { %v112_v40 = vpop.f32.mrf.mxu1 }
 0x10a   :  { %v113_v41 = vadd.f32 %v201_v39, %v112_v40 }
 0x10c   :  { %v115_v42 = vmax.f32 %v113_v41, 0.0 }
 0x10e   :  { %152 = vmatmul.f32.vlgmr.msra.gmra.mxu2 %v115_v42 }
 0x191   :  { %v153_v44 = vpop.f32.mrf.mxu2 }
 0x192   :  { %v154_v45 = vadd.f32 %v202_v43, %v153_v44 }
 0x194   :  { %v195_v46 = vmul.f32 -1.442695, %v154_v45 }
 0x196   :  { %203 = vpow2.f32 %v195_v46 }
 0x19c   :  { %v204_v47 = vpop.eup %203 }
 0x19d   :  { %v159_v48 = vadd.f32 1.0, %v204_v47 }
 0x19f   :  { %205 = vrcp.f32 %v159_v48  ;;  %v171_v52 = vand.u32 2147483648, %v159_v48  ;;  %v169_v54 = vand.u32 2147483647, %v159_v48  ;;  %vm165_vm2 = vweird.f32 %v159_v48 }
 0x1a1   :  { %v172_v56 = vor.u32 1.1754944e-38, %v171_v52  ;;  %vm170_vm5 = vcmp.eq.f32.partialorder %v169_v54, 8.507059e+37 }
 0x1a5   :  { %v206_v49 = vpop.eup %205 }
 0x1a6   :  { %v161_v50 = vmul.f32 %v206_v49, %v159_v48  ;;  %vm166_vm1 = vweird.f32 %v206_v49 }
 0x1a7   :  { %vm167_vm3 = vmor %vm165_vm2, %vm166_vm1 }
 0x1a8   :  { %v162_v51 = vsub.f32 1.0, %v161_v50 }
 0x1aa   :  { %v163_v53 = vmul.f32 %v206_v49, %v162_v51 }
 0x1ac   :  { %v164_v55 = vadd.f32 %v206_v49, %v163_v53 }
 0x1ae   :  { %v168_v57 = vsel %vm167_vm3, %v206_v49, %v164_v55 }
 0x1af   :  { %v173_v58 = vsel %vm170_vm5, %v172_v56, %v168_v57 }
 0x1b0   :  { %176 = vst.msk [vmem:[#allocation5] sm:$0x3] %vm175_vm4, %v173_v58 }
 0x1b1   :  { %187 = dma.vmem_to_hbm [thread:$0]  %s183_s5, 32, %s185_s6, [#allocation4]  }
 0x1b2   :  { %257 = dma.done.wait [#allocation4], 32  }
 0x1b3   :  { %258 = vsyncadd [#allocation4], 4294967264 }
 0x1b4   :  { %192 = vsyncpa [#allocation3], 1 }
 0x1b5   :  { %193 = vsyncpa [#allocation4], 1 }

</bundles_post_ra>
